<compile_context>
chip_gen: v7x
topology: tpu7x:2x2x1
jax: 0.10.0
libtpu: 0.0.40
codegen_flags: <defaults>
</compile_context>

<pallas_src>
import jax
import jax.numpy as jnp
from jax.experimental import pallas as pl
from jax.experimental.pallas import tpu as pltpu


def channel_attention(x_nchw, w1, w2, *, tn=8, thw=None, target_block_bytes=8 << 20):
    """x_nchw: (N, C, H, W); w1: (C_r, C); w2: (C, C_r). Returns (N, C, 1, 1)."""
    N, C, H, W = x_nchw.shape
    C_r, C_in = w1.shape
    assert C_in == C and w2.shape == (C, C_r), (w1.shape, w2.shape, C)
    HW = H * W
    itemsize = x_nchw.dtype.itemsize

    # NCHW -> (N, C, HW): free reshape, spatial on the lane axis.
    x = x_nchw.reshape(N, C, HW)

    # --- batch tiling (no padding; OOB rows of the tail block are dropped) ---
    if N > tn:
        TN = tn
    elif N >= 2:
        TN = -(-N // 2)                   # >=2 "parallel" blocks -> both TCs on v7x
    else:
        TN = 1
    grid_n = pl.cdiv(N, TN)

    # --- spatial tiling: size against the f32 upcast working set -------------
    if thw is None:
        t = target_block_bytes // max(1, TN * C * 4)
        thw = max(128, (t // 128) * 128)
    else:
        thw = max(128, (thw // 128) * 128)
    if thw >= HW:
        thw = HW                          # single step / full-dim block
    grid_k = pl.cdiv(HW, thw)
    rem = HW % thw                        # static tail length (0 -> no mask needed)
    need_mask = rem != 0

    # Pre-transpose the 1x1-conv weights once (loop-invariant; no in-kernel .T).
    w1t = jnp.transpose(w1)               # (C, C_r)
    w2t = jnp.transpose(w2)               # (C_r, C)

    fmin = float(jnp.finfo(jnp.float32).min)
    inv_hw = 1.0 / float(HW)

    def kernel(x_ref, w1t_ref, w2t_ref, o_ref, sum_ref, max_ref):
        k = pl.program_id(1)
        nk = pl.num_programs(1)

        @pl.when(k == 0)
        def _init():
            sum_ref[...] = jnp.zeros_like(sum_ref)
            max_ref[...] = jnp.full_like(max_ref, fmin)

        def accumulate(masked):
            # Stream one (TN, C, thw) tile; accumulate pooling stats in f32.
            xv = x_ref[...].astype(jnp.float32)
            if masked:
                lane = jax.lax.broadcasted_iota(jnp.int32, (1, 1, thw), 2)
                m = lane < rem                                   # static tail mask
                xs = jnp.where(m, xv, 0.0)
                xm = jnp.where(m, xv, fmin)
            else:
                xs = xv
                xm = xv
            sum_ref[...] += jnp.sum(xs, axis=-1)
            max_ref[...] = jnp.maximum(max_ref[...], jnp.max(xm, axis=-1))

        if need_mask:
            @pl.when(k < nk - 1)
            def _steady():
                accumulate(False)

            @pl.when(k == nk - 1)
            def _tail():
                accumulate(True)
        else:
            accumulate(False)

        # Tiny shared-MLP epilogue: once per batch block, on the last step only.
        @pl.when(k == nk - 1)
        def _finish():
            avg = sum_ref[...] * inv_hw                          # (TN, C)
            mx = max_ref[...]                                    # (TN, C)
            stacked = jnp.concatenate([avg, mx], axis=0)         # (2*TN, C)
            w1t_v = w1t_ref[...].astype(jnp.float32)             # (C, C_r)
            w2t_v = w2t_ref[...].astype(jnp.float32)             # (C_r, C)
            h = jnp.maximum(
                jnp.dot(stacked, w1t_v, preferred_element_type=jnp.float32), 0.0)
            y = jnp.dot(h, w2t_v, preferred_element_type=jnp.float32)  # (2*TN, C)
            out = jax.nn.sigmoid(y[:TN] + y[TN:])
            o_ref[...] = out[:, None, :].astype(o_ref.dtype)     # (TN, 1, C)

    block_in_bytes = TN * C * thw * itemsize
    block_f32_bytes = TN * C * thw * 4
    vmem_limit = int(min(
        100 << 20,
        max(24 << 20, 2 * block_in_bytes + 3 * block_f32_bytes + (8 << 20))))

    out = pl.pallas_call(
        kernel,
        out_shape=jax.ShapeDtypeStruct((N, 1, C), x.dtype),
        grid_spec=pltpu.PrefetchScalarGridSpec(
            num_scalar_prefetch=0,
            grid=(grid_n, grid_k),
            in_specs=[
                pl.BlockSpec((TN, C, thw), lambda i, k: (i, 0, k)),
                pl.BlockSpec((C, C_r), lambda i, k: (0, 0)),
                pl.BlockSpec((C_r, C), lambda i, k: (0, 0)),
            ],
            out_specs=pl.BlockSpec((TN, 1, C), lambda i, k: (i, 0, 0)),
            scratch_shapes=[
                pltpu.VMEM((TN, C), jnp.float32),   # running sum
                pltpu.VMEM((TN, C), jnp.float32),   # running max
            ],
        ),
        compiler_params=pltpu.CompilerParams(
            dimension_semantics=("parallel", "arbitrary"),
            vmem_limit_bytes=vmem_limit,
        ),
    )(x, w1t, w2t)

    return out.reshape(N, C, 1, 1)


def _reference(x_nchw, w1, w2):
    # Pure-JAX reference mirroring the PyTorch forward.
    avg = jnp.mean(x_nchw, axis=(2, 3))                       # (N, C)
    mx = jnp.max(x_nchw, axis=(2, 3))                         # (N, C)

    def mlp(v):
        h = jnp.maximum(v @ w1.T, 0.0)
        return h @ w2.T

    out = jax.nn.sigmoid(mlp(avg) + mlp(mx))                  # (N, C)
    return out[:, :, None, None]


if __name__ == "__main__":
    key = jax.random.PRNGKey(0)
    k_x, k_w1, k_w2, k_x2 = jax.random.split(key, 4)

    # Module-consistent small shapes: in_channels=32, ratio=16 -> hidden=2.
    N, C, H, W = 2, 32, 16, 16
    ratio = 16
    C_r = C // ratio

    x = jax.random.normal(k_x, (N, C, H, W), dtype=jnp.float32)
    # Conv2d 1x1, no bias -> (out, in) matrices.
    w1 = jax.random.normal(k_w1, (C_r, C), dtype=jnp.float32) * (1.0 / jnp.sqrt(C))
    w2 = jax.random.normal(k_w2, (C, C_r), dtype=jnp.float32) * (1.0 / jnp.sqrt(C_r))

    out = jax.block_until_ready(channel_attention(x, w1, w2))
    ref = _reference(x, w1, w2)
    assert out.shape == (N, C, 1, 1), out.shape
    assert jnp.allclose(out, ref, atol=1e-5, rtol=1e-5), float(
        jnp.max(jnp.abs(out - ref)))

    # Second case exercises: batch tiling with a ragged tail (N=9, TN=8 ->
    # grid_n=2 with 7 dropped rows), multi-step spatial reduction, and the
    # in-kernel last-step tail masking (HW=576, thw=128 -> rem=64). No padding.
    N2, H2, W2 = 9, 24, 24
    x2 = jax.random.normal(k_x2, (N2, C, H2, W2), dtype=jnp.float32)
    out2 = jax.block_until_ready(channel_attention(x2, w1, w2, thw=128))
    ref2 = _reference(x2, w1, w2)
    assert out2.shape == (N2, C, 1, 1), out2.shape
    assert jnp.allclose(out2, ref2, atol=1e-5, rtol=1e-5), float(
        jnp.max(jnp.abs(out2 - ref2)))

    print("KERNEL_OK")
</pallas_src>

<mosaic_0001>
module attributes {stable_mosaic.version = 11 : i64} {
  func.func @kernel(%arg0: i32, %arg1: i32, %arg2: memref<1x32x256xf32, #tpu.memory_space<vmem>>, %arg3: memref<32x2xf32, #tpu.memory_space<vmem>>, %arg4: memref<2x32xf32, #tpu.memory_space<vmem>>, %arg5: memref<1x1x32xf32, #tpu.memory_space<vmem>>, %arg6: memref<1x32xf32, #tpu.memory_space<vmem>>, %arg7: memref<1x32xf32, #tpu.memory_space<vmem>>) attributes {dimension_semantics = [#tpu.dimension_semantics<parallel>, #tpu.dimension_semantics<arbitrary>], iteration_bounds = array<i64: 2, 1>, scalar_prefetch = 0 : i64, scratch_operands = 2 : i64, tpu.core_type = #tpu.core_type<tc>, window_params = [{transform_indices = @transform_0, window_bounds = array<i64: 1, 32, 256>}, {pipeline_mode = #tpu.pipeline_mode<synchronous>, transform_indices = @transform_1, window_bounds = array<i64: 32, 2>}, {pipeline_mode = #tpu.pipeline_mode<synchronous>, transform_indices = @transform_2, window_bounds = array<i64: 2, 32>}, {transform_indices = @transform_3, window_bounds = array<i64: 1, 1, 32>}]} {
    %c0_i32 = arith.constant 0 : i32
    %0 = arith.cmpi eq, %arg1, %c0_i32 : i32
    %1 = arith.extui %0 : i1 to i32
    %c0_i32_0 = arith.constant 0 : i32
    %2 = arith.cmpi ne, %1, %c0_i32_0 : i32
    scf.if %2 {
      %cst_14 = arith.constant 0.000000e+00 : f32
      %15 = vector.broadcast %cst_14 : f32 to vector<1x32xf32>
      %c0_15 = arith.constant 0 : index
      %c0_16 = arith.constant 0 : index
      %16 = vector.load %arg6[%c0_15, %c0_16] : memref<1x32xf32, #tpu.memory_space<vmem>>, vector<1x32xf32>
      tpu.vector_store %arg6[%c0_15, %c0_16], %15 {strides = array<i32>} : memref<1x32xf32, #tpu.memory_space<vmem>>, vector<1x32xf32>,
      %cst_17 = arith.constant -3.40282347E+38 : f32
      %17 = vector.broadcast %cst_17 : f32 to vector<1x32xf32>
      %c0_18 = arith.constant 0 : index
      %c0_19 = arith.constant 0 : index
      %18 = vector.load %arg7[%c0_18, %c0_19] : memref<1x32xf32, #tpu.memory_space<vmem>>, vector<1x32xf32>
      tpu.vector_store %arg7[%c0_18, %c0_19], %17 {strides = array<i32>} : memref<1x32xf32, #tpu.memory_space<vmem>>, vector<1x32xf32>,
    } else {
    }
    %c0 = arith.constant 0 : index
    %c0_1 = arith.constant 0 : index
    %c0_2 = arith.constant 0 : index
    %3 = vector.load %arg2[%c0, %c0_1, %c0_2] : memref<1x32x256xf32, #tpu.memory_space<vmem>>, vector<1x32x256xf32>
    %c0_3 = arith.constant 0 : index
    %c0_4 = arith.constant 0 : index
    %4 = vector.load %arg6[%c0_3, %c0_4] : memref<1x32xf32, #tpu.memory_space<vmem>>, vector<1x32xf32>
    %cst = arith.constant dense<0.000000e+00> : vector<1x32xf32>
    %5 = vector.multi_reduction <add>, %3, %cst [2] : vector<1x32x256xf32> to vector<1x32xf32>
    %6 = arith.addf %4, %5 : vector<1x32xf32>
    %c0_5 = arith.constant 0 : index
    %c0_6 = arith.constant 0 : index
    %7 = vector.load %arg6[%c0_5, %c0_6] : memref<1x32xf32, #tpu.memory_space<vmem>>, vector<1x32xf32>
    tpu.vector_store %arg6[%c0_5, %c0_6], %6 {strides = array<i32>} : memref<1x32xf32, #tpu.memory_space<vmem>>, vector<1x32xf32>,
    %c0_7 = arith.constant 0 : index
    %c0_8 = arith.constant 0 : index
    %8 = vector.load %arg7[%c0_7, %c0_8] : memref<1x32xf32, #tpu.memory_space<vmem>>, vector<1x32xf32>
    %cst_9 = arith.constant dense<0xFF800000> : vector<1x32xf32>
    %9 = vector.multi_reduction <maximumf>, %3, %cst_9 [2] : vector<1x32x256xf32> to vector<1x32xf32>
    %10 = arith.maximumf %8, %9 : vector<1x32xf32>
    %c0_10 = arith.constant 0 : index
    %c0_11 = arith.constant 0 : index
    %11 = vector.load %arg7[%c0_10, %c0_11] : memref<1x32xf32, #tpu.memory_space<vmem>>, vector<1x32xf32>
    tpu.vector_store %arg7[%c0_10, %c0_11], %10 {strides = array<i32>} : memref<1x32xf32, #tpu.memory_space<vmem>>, vector<1x32xf32>,
    %c0_i32_12 = arith.constant 0 : i32
    %12 = arith.cmpi eq, %arg1, %c0_i32_12 : i32
    %13 = arith.extui %12 : i1 to i32
    %c0_i32_13 = arith.constant 0 : i32
    %14 = arith.cmpi ne, %13, %c0_i32_13 : i32
    scf.if %14 {
      %c0_14 = arith.constant 0 : index
      %c0_15 = arith.constant 0 : index
      %15 = vector.load %arg6[%c0_14, %c0_15] : memref<1x32xf32, #tpu.memory_space<vmem>>, vector<1x32xf32>
      %cst_16 = arith.constant 3.906250e-03 : f32
      %16 = vector.broadcast %cst_16 : f32 to vector<1x32xf32>
      %17 = arith.mulf %15, %16 : vector<1x32xf32>
      %c0_17 = arith.constant 0 : index
      %c0_18 = arith.constant 0 : index
      %18 = vector.load %arg7[%c0_17, %c0_18] : memref<1x32xf32, #tpu.memory_space<vmem>>, vector<1x32xf32>
      %19 = tpu.concatenate %17, %18 in 0 : vector<1x32xf32>, vector<1x32xf32> -> vector<2x32xf32>
      %c0_19 = arith.constant 0 : index
      %c0_20 = arith.constant 0 : index
      %20 = vector.load %arg3[%c0_19, %c0_20] : memref<32x2xf32, #tpu.memory_space<vmem>>, vector<32x2xf32>
      %c0_21 = arith.constant 0 : index
      %c0_22 = arith.constant 0 : index
      %21 = vector.load %arg4[%c0_21, %c0_22] : memref<2x32xf32, #tpu.memory_space<vmem>>, vector<2x32xf32>
      %cst_23 = arith.constant dense<0.000000e+00> : vector<2x2xf32>
      %22 = tpu.matmul %19, %20, %cst_23 {dimension_numbers = #tpu.dot_dimension_numbers<[1], [0], [0], [1], [0, 0, 1, 1], [], []>} : vector<2x32xf32>, vector<32x2xf32>, vector<2x2xf32> -> vector<2x2xf32>
      %cst_24 = arith.constant 0.000000e+00 : f32
      %23 = vector.broadcast %cst_24 : f32 to vector<2x2xf32>
      %24 = arith.maximumf %22, %23 : vector<2x2xf32>
      %cst_25 = arith.constant dense<0.000000e+00> : vector<2x32xf32>
      %25 = tpu.matmul %24, %21, %cst_25 {dimension_numbers = #tpu.dot_dimension_numbers<[1], [0], [0], [1], [0, 0, 1, 1], [], []>} : vector<2x2xf32>, vector<2x32xf32>, vector<2x32xf32> -> vector<2x32xf32>
      %26 = vector.extract_strided_slice %25 {offsets = [0, 0], sizes = [1, 32], strides = [1, 1]} : vector<2x32xf32> to vector<1x32xf32>
      %27 = vector.extract_strided_slice %25 {offsets = [1, 0], sizes = [1, 32], strides = [1, 1]} : vector<2x32xf32> to vector<1x32xf32>
      %28 = arith.addf %26, %27 : vector<1x32xf32>
      %29 = arith.negf %28 : vector<1x32xf32>
      %30 = math.exp %29 : vector<1x32xf32>
      %cst_26 = arith.constant 1.000000e+00 : f32
      %31 = vector.broadcast %cst_26 : f32 to vector<1x32xf32>
      %32 = arith.addf %31, %30 : vector<1x32xf32>
      %33 = arith.divf %31, %32 : vector<1x32xf32>
      %34 = vector.shape_cast %33 : vector<1x32xf32> to vector<1x1x32xf32>
      %c0_27 = arith.constant 0 : index
      %c0_28 = arith.constant 0 : index
      %c0_29 = arith.constant 0 : index
      %35 = vector.load %arg5[%c0_27, %c0_28, %c0_29] : memref<1x1x32xf32, #tpu.memory_space<vmem>>, vector<1x1x32xf32>
      tpu.vector_store %arg5[%c0_27, %c0_28, %c0_29], %34 {strides = array<i32>} : memref<1x1x32xf32, #tpu.memory_space<vmem>>, vector<1x1x32xf32>,
    } else {
    }
    return
  }
  func.func @transform_0(%arg0: i32, %arg1: i32) -> (i32, i32, i32) {
    %c0_i32 = arith.constant 0 : i32
    %c0_i32_0 = arith.constant 0 : i32
    return %arg0, %c0_i32, %arg1 : i32, i32, i32
  }
  func.func @transform_1(%arg0: i32, %arg1: i32) -> (i32, i32) {
    %c0_i32 = arith.constant 0 : i32
    %c0_i32_0 = arith.constant 0 : i32
    %c0_i32_1 = arith.constant 0 : i32
    return %c0_i32, %c0_i32_0 : i32, i32
  }
  func.func @transform_2(%arg0: i32, %arg1: i32) -> (i32, i32) {
    %c0_i32 = arith.constant 0 : i32
    %c0_i32_0 = arith.constant 0 : i32
    %c0_i32_1 = arith.constant 0 : i32
    return %c0_i32, %c0_i32_0 : i32, i32
  }
  func.func @transform_3(%arg0: i32, %arg1: i32) -> (i32, i32, i32) {
    %c0_i32 = arith.constant 0 : i32
    %c0_i32_0 = arith.constant 0 : i32
    %c0_i32_1 = arith.constant 0 : i32
    return %arg0, %c0_i32, %c0_i32_0 : i32, i32, i32
  }
}

</mosaic_0001>

<bundles_post_ra>
// kernel: tpu_custom_call.1
= control target key start
LH: loop header
LB: loop body
LE: loop exit
PB: predicated region body
PF: predicated region fallthrough
CT: control target
= control target key end

     0   :  { %8 = vsyncpa [#allocation5], 0  ;;  %s1898_s0 = inlined_call_operand.hbm [shape: f32[2,32,256], index: 0, kind: input, shape index: {}]   ;;  %s1899_s1 = inlined_call_operand.vmem [shape: f32[32,2], index: 1, kind: input, shape index: {}]   ;;  %s1900_s2 = inlined_call_operand.vmem [shape: f32[2,32], index: 2, kind: input, shape index: {}]   ;;  %s1901_s3 = inlined_call_operand.hbm [shape: f32[2,1,32], index: 3, kind: output, shape index: {}]  }
   0x1   :  { %10 = vsyncpa [#allocation5 + $0x1], 0 }
   0x2   :  { %11 = vsyncpa [#allocation6], 0 }
   0x3   :  { %13 = vsyncpa [#allocation6 + $0x1], 0  ;;  %s1547_s12 = smov 0   ;;  %s1549_s13 = smov 0  }
   0x4   :  { %s1551_s14 = smov 0   ;;  %s1553_s15 = smov 0  }
   0x5   :  { %s1555_s16 = smov 0   ;;  %s1557_s17 = smov 0  }
   0x6 LB: > { %s1280_s18 = sadd.s32 4294967295, %s1515_s17   ;;  %s1281_s19 = sadd.s32 4294967294, %s1515_s17   ;;  %s1515_s17 = sphi %s1557_s17, %s19_s17   ;;  %s1511_s16 = sphi %s1555_s16, %s1916_s16   ;;  %s1507_s15 = sphi %s1553_s15, %s1915_s15   ;;  %s1503_s14 = sphi %s1551_s14, %s1914_s14   ;;  %s1499_s13 = sphi %s1549_s13, %s1913_s13   ;;  %s1495_s12 = sphi %s1547_s12, %s1912_s12  }
   0x7   : > { %s31_s20 = sadd.s32 1, %s1511_s16  ;;  %s40_s21 = sadd.s32 1, %s1503_s14 }
   0x8   : > { %p33_p0 = scmp.ge.s32.totalorder %s31_s20, 2  ;;  %p47_p1 = scmp.ne.s32.totalorder %s1503_s14, %s1499_s13 }
   0x9   : > { %p48_p2 = scmp.eq.s32.totalorder %s1515_s17, 0  ;;  %p53_p3 = scmp.ne.s32.totalorder %s1499_s13, %s1495_s12 }
   0xa   : > { %s1918_s20 = smov (%p33_p0, %s31_s20), 0  ;;  %p54_p5 = scmp.eq.s32.totalorder %s1280_s18, 0 }
   0xb   : > { %p1588_p4 = por %p48_p2, %p47_p1  ;;  %s35_s23 = ssub.s32 %s1511_s16, %s1918_s20 }
   0xc   : > { %p119_p6 = scmp.eq.s32.totalorder %s1280_s18, 1  ;;  %p38_p7 = scmp.eq.s32.totalorder %s35_s23, 0 }
   0xd   : > { %p1594_p8 = por %p54_p5, %p53_p3  ;;  %p125_p10 = scmp.eq.s32.totalorder %s1281_s19, 1 }
   0xe   : > { %p1598_p9 = por %p119_p6, %p47_p1  ;;  %p1339_p13 = scmp.lt.s32.totalorder %s1515_s17, 2 }
   0xf   : > { %s1603_s26 = scalar_select %p38_p7, %s1503_s14, %s40_s21  }
  0x10   : > { %s1905_s25 = scalar_select %p1598_p9, 1, 0 }
  0x11   : > { %p1605_p11 = por %p125_p10, %p53_p3  ;;  %s151_s28 = sand.u32 1, %s1503_s14  }
  0x12   : > { %s1284_s29 = sshll.u32 %s151_s28, 6  ;;  %s1297_s30 = sshll.u32 %s1511_s16, 10 }
  0x13   : > { %s1906_s27 = scalar_select %p1605_p11, 1, 0 }
  0x14   : > { %s1616_s6 = scalar_lea.hbm %s1898_s0, %s1297_s30  ;;  %s155_s7 = scalar_lea.vmem [#allocation4], %s1284_s29 }
  0x15   : > { %s164_s8 = sshll.u32 %s155_s7, 4  ;;  %p1622_p0 = pnand %p1339_p13, %p1588_p4  ;;  %s1618_s8 = int_to_ptr.vmem [resolvable:$true] %s164_s8 }
  0x16   : > { %s1627_s10 = scalar_lea.sflag [#allocation5], %s151_s28  ;;  %s1403_s11 = scalar_lea.hbm %s1616_s6, 1024 }
  0x17   : > { %p1404_p2 = scmp.ne.s32.totalorder %s1616_s6, %s1403_s11  ;;  %p1405_p3 = pneg %p1622_p0 }
  0x18   : > { %s1408_s21 = scalar_lea.hbm %s1898_s0, 2048  ;;  %p1409_p4 = scmp.lt.u32.totalorder %s1616_s6, %s1898_s0 }
  0x19   : > { %p1406_p5 = pnand %p1405_p3, %p1404_p2  ;;  %p1410_p7 = scmp.lt.u32.totalorder %s1408_s21, %s1403_s11 }
  0x1a   : > { %p1412_p13 = scmp.lt.u32.totalorder %s1403_s11, %s1616_s6 }
  0x1b   : > { %p1407_p6 = pneg %p1406_p5  ;;  %p1411_p10 = por %p1410_p7, %p1409_p4 }
  0x1d   : > { %p1413_p12 = por %p1412_p13, %p1411_p10 }
  0x1f   : > { %p1414_p1 = pnand %p1413_p12, %p1407_p6 }
  0x21   : > { %1417 = shalt.err (!%p1414_p1)
}
  0x22   : > { %s1418_s28 = scalar_lea.vmem %s1618_s8, 1024  ;;  %s1517_s29 = smov [#allocation4]  }
  0x23   : > { %p1419_p2 = scmp.ne.s32.totalorder %s1618_s8, %s1418_s28  ;;  %s1423_s30 = sshll.u32 %s1517_s29, 4  ;;  %s1424_s30 = int_to_ptr.vmem [resolvable:$false] %s1423_s30 }
  0x24   : > { %s1425_s4 = scalar_lea.vmem %s1424_s30, 2048  ;;  %p1426_p9 = scmp.lt.s32.totalorder %s1618_s8, %s1424_s30 }
  0x25   : > { %p1421_p5 = pnand %p1419_p2, %p1405_p3  ;;  %p1427_p4 = scmp.lt.s32.totalorder %s1425_s4, %s1418_s28 }
  0x27   : > { %p1422_p11 = pneg %p1421_p5  ;;  %p1428_p7 = por %p1427_p4, %p1426_p9 }
  0x29   : > { %p1429_p10 = pnand %p1428_p7, %p1422_p11 }
  0x2b   : > { %1432 = shalt.err (!%p1429_p10)
}
  0x2c   : > { %s1518_s5 = smov 256   ;;  %s1519_s7 = smov 16  }
  0x2d   : > { %1334 = dma.hbm_to_vmem [thread:$0]  (!%p1622_p0), %s1616_s6, 1024, %s1618_s8, %s1627_s10, %s1518_s5, %s1518_s5, %s1519_s7  }
  0x2e   : > { %p172_p12 = scmp.lt.s32.totalorder %s1515_s17, 3  ;;  %p1908_p1 = scmp.ge.s32.totalorder %s1515_s17, 1 }
  0x30   : > { %p173_p3 = pnand %p1908_p1, %p172_p12 }
  0x31   : > { %s1659_s11 = sand.u32 (!%p173_p3), 1, %s1499_s13  }
  0x32   : > { %176 = sbr.rel (%p173_p3) target bundleno = 868 (0x364), region = 32  ;;  %s1288_s18 = sshll.u32 (!%p173_p3), %s1659_s11, 6 }
  0x33   : > { %s179_s19 = scalar_lea.sflag (!%p173_p3), [#allocation5], %s1659_s11  ;;  %s182_s21 = scalar_lea.vmem (!%p173_p3), [#allocation4], %s1288_s18 }
  0x39   : > { %1486 = dma.done.wait (%p1594_p8), %s179_s19, 1024  }
  0x3a   : > { %1488 = vsyncadd (%p1594_p8), %s179_s19, 4294966272  ;;  %v212_v0 = vld [vmem:[%s182_s21] sm:$0xff]  ;;  %v213_v1 = vld [vmem:[%s182_s21 + $0x8] sm:$0xff]  ;;  %v1520_v16 = vmov 0   ;;  %v237_v17 = vlaneseq  ;;  %v1521_v18 = vmov 1966171168  }
  0x3b   : > { %v214_v2 = vld [vmem:[%s182_s21 + $0x10] sm:$0xff]  ;;  %v221_v3 = vadd.f32 %v213_v1, %v212_v0  ;;  %v215_v4 = vld [vmem:[%s182_s21 + $0x18] sm:$0xff]  ;;  %v216_v5 = vld [vmem:[%s182_s21 + $0x20] sm:$0xff]  ;;  %v619_v12 = vmax.f32 %v212_v0, %v213_v1  ;;  %1397 = vset.pattern.permute.xlu0 %v1520_v16  ;;  %1398 = vset.pattern.permute.xlu1 %v1520_v16  ;;  %v370_v19 = vunpack.c.l.s4 %v1521_v18  ;;  %vm209_vm0 = vcmask 253952   ;;  %s1294_s4 = sshll.u32 %s1507_s15, 4  ;;  %s203_s5 = scalar_lea.vmem [#allocation7], %s1659_s11 }
  0x3c   : > { %v217_v6 = vld [vmem:[%s182_s21 + $0x28] sm:$0xff]  ;;  %v218_v8 = vld [vmem:[%s182_s21 + $0x30] sm:$0xff]  ;;  %v219_v9 = vld [vmem:[%s182_s21 + $0x38] sm:$0xff]  ;;  %v224_v10 = vadd.f32 %v215_v4, %v214_v2  ;;  %v622_v13 = vmax.f32 %v214_v2, %v215_v4  ;;  %v1668_v20 = vshrl.u32 %v237_v17, 7  ;;  %vm1525_vm1 = vmmov 0   ;;  %s1203_s7 = sshll.u32 %s203_s5, 4  ;;  %s1848_s21 = scalar_lea.hbm %s1901_s3, %s1294_s4  ;;  %s1850_s7 = int_to_ptr.vmem [resolvable:$true] %s1203_s7 }
  0x3d   : > { %v227_v7 = vadd.f32 %v217_v6, %v216_v5  ;;  %222 = vadd.xlane.f32.xlu0 %v221_v3  ;;  %v230_v11 = vadd.f32 %v219_v9, %v218_v8  ;;  %v625_v14 = vmax.f32 %v216_v5, %v217_v6  ;;  %v628_v15 = vmax.f32 %v218_v8, %v219_v9  ;;  %s1191_s24 = scalar_lea.sflag [#allocation6], %s1659_s11  ;;  %s1433_s6 = scalar_lea.vmem %s1850_s7, 16 }
  0x3e   : > { %v371_v21 = vunpack.c.0.s8 %v370_v19  ;;  %v1671_v22 = vsub.s32 0, %v1668_v20  ;;  %v1674_v23 = vsub.s32 1, %v1668_v20  ;;  %v1677_v24 = vsub.s32 2, %v1668_v20  ;;  %p1434_p8 = scmp.ne.s32.totalorder %s1850_s7, %s1433_s6  ;;  %p1909_p9 = scmp.ne.s32.totalorder %s1905_s25, 0 }
  0x3f   : > { %228 = vadd.xlane.f32.xlu1 %v227_v7  ;;  %v1680_v25 = vsub.s32 3, %v1668_v20  ;;  %v1683_v26 = vsub.s32 4, %v1668_v20  ;;  %v1686_v27 = vsub.s32 5, %v1668_v20  ;;  %v1689_v28 = vsub.s32 6, %v1668_v20  ;;  %s1526_s15 = smov [#allocation7]  }
  0x40   : > { %v1692_v29 = vsub.s32 7, %v1668_v20  ;;  %v1695_v31 = vsub.s32 %v371_v21, %v1668_v20  ;;  %vm584_vm2 = vcmask 130112   ;;  %vm591_vm3 = vcmask 195712   ;;  %p1435_p11 = pnand %p1434_p8, %p1909_p9  ;;  %s1437_s8 = sshll.u32 %s1526_s15, 4  ;;  %s1438_s8 = int_to_ptr.vmem [resolvable:$false] %s1437_s8 }
  0x41   : > { %225 = vadd.xlane.f32.xlu0 %v224_v10  ;;  %vm598_vm4 = vcmask 261312   ;;  %vm1019_vm5 = vcmask 1040384   ;;  %vm1026_vm6 = vcmask 261120   ;;  %vm1105_vm7 = vcmask 1041408   ;;  %s1439_s9 = scalar_lea.vmem %s1438_s8, 32  ;;  %p1440_p6 = scmp.lt.s32.totalorder %s1850_s7, %s1438_s8 }
  0x42   : > { %vm1101_vm8 = vcmask 15360   ;;  %p1436_p0 = pneg %p1435_p11  ;;  %p1441_p13 = scmp.lt.s32.totalorder %s1439_s9, %s1433_s6 }
  0x43   : > { %231 = vadd.xlane.f32.xlu1 %v230_v11 }
  0x44   : > { %p1442_p2 = por %p1441_p13, %p1440_p6 }
  0x45   : > { %620 = vmax.xlane.f32.xlu0 %v619_v12 }
  0x46   : > { %p1443_p5 = pnand %p1442_p2, %p1436_p0 }
  0x47   : > { %623 = vmax.xlane.f32.xlu1 %v622_v13 }
  0x49   : > { %626 = vmax.xlane.f32.xlu0 %v625_v14 }
  0x4b   : > { %629 = vmax.xlane.f32.xlu1 %v628_v15 }
  0xca   : > { %v223_v30 = vpop.xlane.xlu0 %222 }
  0xcb   : > { %v240_v33 = vrot.slane %v223_v30, %v1671_v22  ;;  %v244_v34 = vrot.slane %v223_v30, %v1674_v23  ;;  %v248_v35 = vrot.slane %v223_v30, %v1677_v24  ;;  %v252_v36 = vrot.slane %v223_v30, %v1680_v25 }
  0xcc   : > { %v229_v32 = vpop.xlane.xlu1 %228  ;;  %v256_v37 = vrot.slane %v223_v30, %v1683_v26  ;;  %v260_v38 = vrot.slane %v223_v30, %v1686_v27  ;;  %v264_v39 = vrot.slane %v223_v30, %v1689_v28  ;;  %v268_v40 = vrot.slane %v223_v30, %v1692_v29 }
  0xcd   : > { %v365_v41 = vcombine.low %v240_v33, %v244_v34  ;;  %v366_v42 = vcombine.low %v248_v35, %v252_v36  ;;  %v304_v43 = vrot.slane %v229_v32, %v1671_v22  ;;  %v308_v44 = vrot.slane %v229_v32, %v1674_v23 }
  0xce   : > { %v226_v45 = vpop.xlane.xlu0 %225  ;;  %v367_v46 = vcombine.low %v256_v37, %v260_v38  ;;  %v368_v47 = vcombine.low %v264_v39, %v268_v40  ;;  %v312_v48 = vrot.slane %v229_v32, %v1677_v24  ;;  %v316_v49 = vrot.slane %v229_v32, %v1680_v25 }
  0xcf   : > { %v375_v50 = vrot.slane %v365_v41, %v1695_v31  ;;  %v382_v51 = vrot.slane %v366_v42, %v1695_v31  ;;  %v272_v52 = vrot.slane %v226_v45, %v1671_v22  ;;  %v276_v53 = vrot.slane %v226_v45, %v1674_v23 }
  0xd0   : > { %v389_v54 = vrot.slane %v367_v46, %v1695_v31  ;;  %v396_v55 = vrot.slane %v368_v47, %v1695_v31  ;;  %v280_v56 = vrot.slane %v226_v45, %v1677_v24  ;;  %v284_v57 = vrot.slane %v226_v45, %v1680_v25  ;;  %v232_v6 = vpop.xlane.xlu1 %231 }
  0xd1   : > { %v397_v58 = vcombine.low %v375_v50, %v382_v51  ;;  %v288_v59 = vrot.slane %v226_v45, %v1683_v26  ;;  %v292_v60 = vrot.slane %v226_v45, %v1686_v27  ;;  %v296_v61 = vrot.slane %v226_v45, %v1689_v28 }
  0xd2   : > { %v398_v62 = vcombine.low %v389_v54, %v396_v55  ;;  %v300_v63 = vrot.slane %v226_v45, %v1692_v29  ;;  %v414_v0 = vcombine.low %v272_v52, %v276_v53  ;;  %v415_v1 = vcombine.low %v280_v56, %v284_v57  ;;  %v621_v42 = vpop.xlane.xlu0 %620 }
  0xd3   : > { %v405_v2 = vrot.slane %v397_v58, %v1695_v31  ;;  %v416_v3 = vcombine.low %v288_v59, %v292_v60  ;;  %v320_v4 = vrot.slane %v229_v32, %v1683_v26  ;;  %v324_v5 = vrot.slane %v229_v32, %v1686_v27 }
  0xd4   : > { %v412_v7 = vrot.slane %v398_v62, %v1695_v31  ;;  %v417_v8 = vcombine.low %v296_v61, %v300_v63  ;;  %v424_v9 = vrot.slane %v414_v0, %v1695_v31  ;;  %v431_v10 = vrot.slane %v415_v1, %v1695_v31  ;;  %v624_v59 = vpop.xlane.xlu1 %623 }
  0xd5   : > { %v438_v11 = vrot.slane %v416_v3, %v1695_v31  ;;  %v328_v12 = vrot.slane %v229_v32, %v1689_v28  ;;  %v332_v13 = vrot.slane %v229_v32, %v1692_v29  ;;  %v463_v14 = vcombine.low %v304_v43, %v308_v44 }
  0xd6   : > { %v413_v15 = vcombine.low %v405_v2, %v412_v7  ;;  %v445_v16 = vrot.slane %v417_v8, %v1695_v31  ;;  %v446_v18 = vcombine.low %v424_v9, %v431_v10  ;;  %v464_v19 = vcombine.low %v312_v48, %v316_v49 }
  0xd7   : > { %v465_v21 = vcombine.low %v320_v4, %v324_v5  ;;  %v466_v30 = vcombine.low %v328_v12, %v332_v13  ;;  %v473_v33 = vrot.slane %v463_v14, %v1695_v31  ;;  %v336_v34 = vrot.slane %v232_v6, %v1671_v22 }
  0xd8   : > { %562 = vperm.xlu0 %1397, %v413_v15   ;;  %v447_v35 = vcombine.low %v438_v11, %v445_v16  ;;  %v454_v36 = vrot.slane %v446_v18, %v1695_v31  ;;  %v480_v37 = vrot.slane %v464_v19, %v1695_v31  ;;  %v340_v32 = vrot.slane %v232_v6, %v1674_v23 }
  0xd9   : > { %v487_v38 = vrot.slane %v465_v21, %v1695_v31  ;;  %v494_v39 = vrot.slane %v466_v30, %v1695_v31  ;;  %v344_v40 = vrot.slane %v232_v6, %v1677_v24  ;;  %v348_v41 = vrot.slane %v232_v6, %v1680_v25  ;;  %v627_v30 = vpop.xlane.xlu0 %626 }
  0xda   : > { %v461_v43 = vrot.slane %v447_v35, %v1695_v31  ;;  %v495_v44 = vcombine.low %v473_v33, %v480_v37  ;;  %v352_v45 = vrot.slane %v232_v6, %v1683_v26  ;;  %v356_v46 = vrot.slane %v232_v6, %v1686_v27 }
  0xdb   : > { %v496_v47 = vcombine.low %v487_v38, %v494_v39  ;;  %v360_v48 = vrot.slane %v232_v6, %v1689_v28  ;;  %v364_v49 = vrot.slane %v232_v6, %v1692_v29  ;;  %v512_v50 = vcombine.low %v336_v34, %v340_v32 }
  0xdc   : > { %v462_v51 = vcombine.low %v454_v36, %v461_v43  ;;  %v503_v52 = vrot.slane %v495_v44, %v1695_v31  ;;  %v513_v53 = vcombine.low %v344_v40, %v348_v41  ;;  %v514_v54 = vcombine.low %v352_v45, %v356_v46 }
  0xdd   : > { %v510_v55 = vrot.slane %v496_v47, %v1695_v31  ;;  %v515_v56 = vcombine.low %v360_v48, %v364_v49  ;;  %v522_v57 = vrot.slane %v512_v50, %v1695_v31  ;;  %v638_v58 = vrot.slane %v621_v42, %v1671_v22 }
  0xde   : > { %565 = vperm.xlu1 %1398, %v462_v51   ;;  %v529_v60 = vrot.slane %v513_v53, %v1695_v31  ;;  %v536_v61 = vrot.slane %v514_v54, %v1695_v31  ;;  %v642_v62 = vrot.slane %v621_v42, %v1674_v23  ;;  %v646_v63 = vrot.slane %v621_v42, %v1677_v24 }
  0xdf   : > { %v511_v0 = vcombine.low %v503_v52, %v510_v55  ;;  %v543_v1 = vrot.slane %v515_v56, %v1695_v31  ;;  %v650_v2 = vrot.slane %v621_v42, %v1680_v25  ;;  %v654_v3 = vrot.slane %v621_v42, %v1683_v26  ;;  %v630_v52 = vpop.xlane.xlu1 %629 }
  0xe0   : > { %v544_v4 = vcombine.low %v522_v57, %v529_v60  ;;  %v658_v5 = vrot.slane %v621_v42, %v1686_v27  ;;  %v662_v6 = vrot.slane %v621_v42, %v1689_v28  ;;  %v666_v7 = vrot.slane %v621_v42, %v1692_v29 }
  0xe1   : > { %v545_v8 = vcombine.low %v536_v61, %v543_v1  ;;  %v763_v9 = vcombine.low %v638_v58, %v642_v62  ;;  %v764_v10 = vcombine.low %v646_v63, %v650_v2  ;;  %v670_v11 = vrot.slane %v624_v59, %v1671_v22 }
  0xe2   : > { %568 = vperm.xlu1 %1398, %v511_v0   ;;  %v552_v12 = vrot.slane %v544_v4, %v1695_v31  ;;  %v765_v13 = vcombine.low %v654_v3, %v658_v5  ;;  %v766_v14 = vcombine.low %v662_v6, %v666_v7  ;;  %v674_v15 = vrot.slane %v624_v59, %v1674_v23 }
  0xe3   : > { %v559_v16 = vrot.slane %v545_v8, %v1695_v31  ;;  %v773_v18 = vrot.slane %v763_v9, %v1695_v31  ;;  %v780_v19 = vrot.slane %v764_v10, %v1695_v31  ;;  %v678_v21 = vrot.slane %v624_v59, %v1677_v24 }
  0xe4   : > { %v787_v33 = vrot.slane %v765_v13, %v1695_v31  ;;  %v794_v34 = vrot.slane %v766_v14, %v1695_v31  ;;  %v682_v35 = vrot.slane %v624_v59, %v1680_v25  ;;  %v686_v36 = vrot.slane %v624_v59, %v1683_v26 }
  0xe5   : > { %v560_v37 = vcombine.low %v552_v12, %v559_v16  ;;  %v795_v32 = vcombine.low %v773_v18, %v780_v19  ;;  %v690_v38 = vrot.slane %v624_v59, %v1686_v27  ;;  %v694_v39 = vrot.slane %v624_v59, %v1689_v28 }
  0xe6   : > { %v796_v40 = vcombine.low %v787_v33, %v794_v34  ;;  %v698_v41 = vrot.slane %v624_v59, %v1692_v29  ;;  %v812_v42 = vcombine.low %v670_v11, %v674_v15  ;;  %v813_v43 = vcombine.low %v678_v21, %v682_v35 }
  0xe7   : > { %571 = vperm.xlu1 %1398, %v560_v37   ;;  %v803_v44 = vrot.slane %v795_v32, %v1695_v31  ;;  %v814_v45 = vcombine.low %v686_v36, %v690_v38  ;;  %v702_v46 = vrot.slane %v627_v30, %v1671_v22  ;;  %v706_v47 = vrot.slane %v627_v30, %v1674_v23 }
  0xe8   : > { %v810_v48 = vrot.slane %v796_v40, %v1695_v31  ;;  %v815_v49 = vcombine.low %v694_v39, %v698_v41  ;;  %v822_v50 = vrot.slane %v812_v42, %v1695_v31  ;;  %v829_v51 = vrot.slane %v813_v43, %v1695_v31  ;;  %v1021_v42 = vld [vmem:[%s1899_s1] sm:$0xff]  ;;  %v1022_v43 = vld [vmem:[%s1899_s1 + $0x8] sm:$0xff] }
  0xe9   : > { %v836_v53 = vrot.slane %v814_v45, %v1695_v31  ;;  %v710_v54 = vrot.slane %v627_v30, %v1677_v24  ;;  %v714_v55 = vrot.slane %v627_v30, %v1680_v25  ;;  %v718_v56 = vrot.slane %v627_v30, %v1683_v26  ;;  %v1023_v45 = vld [vmem:[%s1899_s1 + $0x10] sm:$0xff] }
  0xea   : > { %v811_v57 = vcombine.low %v803_v44, %v810_v48  ;;  %v843_v58 = vrot.slane %v815_v49, %v1695_v31  ;;  %v844_v59 = vcombine.low %v822_v50, %v829_v51  ;;  %v722_v60 = vrot.slane %v627_v30, %v1686_v27 }
  0xeb   : > { %v726_v61 = vrot.slane %v627_v30, %v1689_v28  ;;  %v730_v62 = vrot.slane %v627_v30, %v1692_v29  ;;  %v861_v63 = vcombine.low %v702_v46, %v706_v47  ;;  %v862_v0 = vcombine.low %v710_v54, %v714_v55  ;;  %v1024_v46 = vld [vmem:[%s1899_s1 + $0x18] sm:$0xff] }
  0xec   : > { %960 = vperm.xlu1 %1398, %v811_v57   ;;  %v845_v1 = vcombine.low %v836_v53, %v843_v58  ;;  %v852_v2 = vrot.slane %v844_v59, %v1695_v31  ;;  %v863_v3 = vcombine.low %v718_v56, %v722_v60  ;;  %v734_v4 = vrot.slane %v630_v52, %v1671_v22 }
  0xed   : > { %v864_v5 = vcombine.low %v726_v61, %v730_v62  ;;  %v871_v6 = vrot.slane %v861_v63, %v1695_v31  ;;  %v878_v7 = vrot.slane %v862_v0, %v1695_v31  ;;  %v738_v8 = vrot.slane %v630_v52, %v1674_v23 }
  0xee   : > { %v859_v9 = vrot.slane %v845_v1, %v1695_v31  ;;  %v885_v10 = vrot.slane %v863_v3, %v1695_v31  ;;  %v742_v11 = vrot.slane %v630_v52, %v1677_v24  ;;  %v746_v12 = vrot.slane %v630_v52, %v1680_v25 }
  0xef   : > { %v892_v13 = vrot.slane %v864_v5, %v1695_v31  ;;  %v893_v14 = vcombine.low %v871_v6, %v878_v7  ;;  %v750_v22 = vrot.slane %v630_v52, %v1683_v26  ;;  %v754_v15 = vrot.slane %v630_v52, %v1686_v27 }
  0xf0   : > { %v860_v16 = vcombine.low %v852_v2, %v859_v9  ;;  %v758_v18 = vrot.slane %v630_v52, %v1689_v28  ;;  %v762_v23 = vrot.slane %v630_v52, %v1692_v29  ;;  %v910_v19 = vcombine.low %v734_v4, %v738_v8 }
  0xf1   : > { %v894_v21 = vcombine.low %v885_v10, %v892_v13  ;;  %v901_v30 = vrot.slane %v893_v14, %v1695_v31  ;;  %v911_v33 = vcombine.low %v742_v11, %v746_v12  ;;  %v912_v24 = vcombine.low %v750_v22, %v754_v15 }
  0xf2   : > { %963 = vperm.xlu1 %1398, %v860_v16   ;;  %v913_v25 = vcombine.low %v758_v18, %v762_v23  ;;  %v920_v34 = vrot.slane %v910_v19, %v1695_v31  ;;  %v1522_v38 = vmov 0.0   ;;  %v1523_v41 = vmov -3.4028235e+38  }
  0xf3   : > { %v908_v35 = vrot.slane %v894_v21, %v1695_v31  ;;  %v927_v26 = vrot.slane %v911_v33, %v1695_v31  ;;  %v934_v27 = vrot.slane %v912_v24, %v1695_v31  ;;  %210 = vst.msk [vmem:[#allocation2] sm:$0x1] %vm209_vm0, %v1522_v38  ;;  %1316 = vmatprep.subr.mxu1 %v1522_v38  ;;  %211 = vst.msk [vmem:[#allocation3] sm:$0x1] %vm209_vm0, %v1523_v41  ;;  %v1524_v47 = vmov 0.0|0.0  }
  0xf4   : > { %v941_v28 = vrot.slane %v913_v25, %v1695_v31  ;;  %v1322_v44 = vpack.c.bf16 %v1022_v43, %v1021_v42  ;;  %1321 = vmatprep.subr.bf16.mxu0 %v1524_v47  ;;  %1313 = vmatprep.mubr.msk.f32.mxu0 %vm1525_vm1, %v1522_v38  ;;  %v1325_v48 = vpack.c.bf16 %v1024_v46, %v1023_v45  ;;  %v574_v49 = vand.u32 127, %v237_v17  ;;  %v1025_v25 = vld [vmem:[%s1900_s2] sm:$0x3] }
  0xf5   : > { %v909_v36 = vcombine.low %v901_v30, %v908_v35  ;;  %v942_v29 = vcombine.low %v920_v34, %v927_v26  ;;  %1318 = vmatprep.mubr.msk.f32.mxu1 %vm1525_vm1, %v1522_v38  ;;  %1317 = vmatpush3.msk.msra.mxu1 %vm1105_vm7, %v1025_v25 }
  0xf6   : > { %v943_v37 = vcombine.low %v934_v27, %v941_v28  ;;  %1323 = vmatpush3.bf16.msra.mxu0 %v1322_v44  ;;  %v579_v50 = vadd.s32 4294967288, %v574_v49  ;;  %v586_v51 = vadd.s32 4294967280, %v574_v49  ;;  %v593_v54 = vadd.s32 4294967272, %v574_v49 }
  0xf7   : > { %966 = vperm.xlu1 %1398, %v909_v36   ;;  %v950_v32 = vrot.slane %v942_v29, %v1695_v31  ;;  %1324 = vmatprep.subr.bf16.mxu0 %v1524_v47  ;;  %v577_v56 = vsub.s32 %v574_v49, %v1668_v20 }
  0xf8   : > { %v957_v39 = vrot.slane %v943_v37, %v1695_v31  ;;  %v582_v53 = vsub.s32 %v579_v50, %v1668_v20  ;;  %v589_v55 = vsub.s32 %v586_v51, %v1668_v20  ;;  %v596_v60 = vsub.s32 %v593_v54, %v1668_v20 }
  0xfa   : > { %v958_v40 = vcombine.low %v950_v32, %v957_v39  ;;  %1326 = vmatpush3.bf16.msra.mxu0 %v1325_v48  ;;  %v220_v5 = vld [vmem:[#allocation2] sm:$0x1]  ;;  %v618_v18 = vld [vmem:[#allocation3] sm:$0x1] }
  0xfc   : > { %969 = vperm.xlu1 %1398, %v958_v40  }
 0x157   : > { %v563_v58 = vpop.permute.xlu0 %562 }
 0x158   : > { %v578_v62 = vrot.slane %v563_v58, %v577_v56 }
 0x15d   : > { %v566_v52 = vpop.permute.xlu1 %565 }
 0x15e   : > { %v583_v59 = vrot.slane %v566_v52, %v582_v53 }
 0x160   : > { %v585_v63 = vsel %vm584_vm2, %v583_v59, %v578_v62 }
 0x161   : > { %v569_v57 = vpop.permute.xlu1 %568 }
 0x162   : > { %v590_v61 = vrot.slane %v569_v57, %v589_v55 }
 0x164   : > { %v592_v1 = vsel %vm591_vm3, %v590_v61, %v585_v63 }
 0x166   : > { %v572_v17 = vpop.permute.xlu1 %571 }
 0x167   : > { %v597_v0 = vrot.slane %v572_v17, %v596_v60 }
 0x169   : > { %v599_v2 = vsel %vm598_vm4, %v597_v0, %v592_v1 }
 0x16a   : > { %v606_v3 = vrot.slane %v599_v2, %v1695_v31 }
 0x16b   : > { %v961_v4 = vpop.permute.xlu1 %960 }
 0x16c   : > { %v613_v6 = vrot.slane %v606_v3, %v1695_v31  ;;  %v974_v11 = vrot.slane %v961_v4, %v577_v56 }
 0x16e   : > { %v615_v20 = vadd.f32 %v613_v6, %v220_v5 }
 0x170   : > { %617 = vst.msk [vmem:[#allocation2] sm:$0x1] %vm209_vm0, %v615_v20 }
 0x171   : > { %v964_v7 = vpop.permute.xlu1 %963 }
 0x172   : > { %v978_v9 = vrot.slane %v964_v7, %v582_v53 }
 0x174   : > { %v979_v13 = vsel %vm584_vm2, %v978_v9, %v974_v11 }
 0x176   : > { %v967_v8 = vpop.permute.xlu1 %966 }
 0x177   : > { %v983_v10 = vrot.slane %v967_v8, %v589_v55  ;;  %v1010_v21 = vld [vmem:[#allocation2] sm:$0x1] }
 0x178   : > { %v1011_v30 = vmul.f32 0.00390625, %v1010_v21 }
 0x179   : > { %v984_v22 = vsel %vm591_vm3, %v983_v10, %v979_v13 }
 0x17b   : > { %v970_v12 = vpop.permute.xlu1 %969 }
 0x17c   : > { %v988_v14 = vrot.slane %v970_v12, %v596_v60 }
 0x17e   : > { %v989_v15 = vsel %vm598_vm4, %v988_v14, %v984_v22 }
 0x17f   : > { %v996_v16 = vrot.slane %v989_v15, %v1695_v31 }
 0x181   : > { %v1003_v23 = vrot.slane %v996_v16, %v1695_v31 }
 0x183   : > { %v1005_v19 = vmax.f32 %v618_v18, %v1003_v23 }
 0x185   : > { %1006 = vst.msk [vmem:[#allocation3] sm:$0x1] %vm209_vm0, %v1005_v19 }
 0x18c   : > { %v1289_v33 = vld [vmem:[#allocation3] ss:$0 sm:$0xff] }
 0x18d   : > { %v1020_v24 = vsel %vm1019_vm5, %v1011_v30, %v1289_v33 }
 0x18e   : > { %1314 = vmatmul.mubr.msk.f32.vlgmr.msra.gmra.mrb[0].mxu0 %vm1026_vm6, %v1020_v24 }
 0x261   : > { %v1096_v34 = vpop.f32.mrb[0].mxu0 }
 0x262   : > { %v1100_v31 = vmax.f32 %v1096_v34, 0.0  ;;  %v1315_v35 = vpop.f32.mrb[1].mxu0 }
 0x264   : > { %1319 = vmatmul.mubr.msk.f32.vlgmr.msra.gmra.mrb[0].mxu1 %vm1101_vm8, %v1100_v31 }
 0x337   : > { %v1175_v26 = vpop.f32.mrb[0].mxu1 }
 0x338   : > { %v1180_v27 = vrot.slane %v1175_v26, 1  ;;  %v1320_v28 = vpop.f32.mrb[1].mxu1 }
 0x33a   : > { %v1182_v36 = vadd.f32 %v1180_v27, %v1175_v26 }
 0x33c   : > { %v1293_v29 = vmul.f32 -1.442695, %v1182_v36 }
 0x33e   : > { %1399 = vpow2.f32 %v1293_v29 }
 0x348   : > { %v1400_v37 = vpop.eup %1399 }
 0x349   : > { %v1186_v32 = vadd.f32 1.0, %v1400_v37 }
 0x34b   : > { %1401 = vrcp.f32 %v1186_v32 }
 0x355   : > { %v1402_v38 = vpop.eup %1401 }
 0x356   : > { %1189 = vst.msk [vmem:[%s203_s5] sm:$0x1] %vm209_vm0, %v1402_v38 }
 0x357   : > { %1446 = shalt.err (!%p1443_p5)
}
 0x358   : > { %s1447_s11 = scalar_lea.hbm %s1848_s21, 16  ;;  %s1451_s23 = scalar_lea.hbm %s1901_s3, 32 }
 0x359   : > { %p1448_p4 = scmp.ne.s32.totalorder %s1848_s21, %s1447_s11  ;;  %p1452_p12 = scmp.lt.u32.totalorder %s1848_s21, %s1901_s3 }
 0x35a   : > { %p1453_p1 = scmp.lt.u32.totalorder %s1451_s23, %s1447_s11  ;;  %p1455_p8 = scmp.lt.u32.totalorder %s1447_s11, %s1848_s21 }
 0x35b   : > { %p1449_p7 = pnand %p1448_p4, %p1909_p9 }
 0x35c   : > { %p1454_p3 = por %p1453_p1, %p1452_p12 }
 0x35d   : > { %p1450_p10 = pneg %p1449_p7 }
 0x35e   : > { %p1456_p11 = por %p1455_p8, %p1454_p3 }
 0x360   : > { %p1457_p0 = pnand %p1456_p11, %p1450_p10 }
 0x362   : > { %1460 = shalt.err (!%p1457_p0)
}
 0x363   : > { %1329 = dma.vmem_to_hbm [thread:$0]  (%p1909_p9), %s1850_s7, 16, %s1848_s21, %s1191_s24  }
 0x364 PF: > { %s1215_s30 = sand.u32 1, %s1495_s12   ;;  %p1910_p6 = scmp.ne.s32.totalorder %s1906_s27, 0 }
 0x365   : > { %p1911_p13 = scmp.ge.s32.totalorder %s1515_s17, 2  ;;  %s1216_s4 = scalar_lea.sflag [#allocation6], %s1215_s30 }
 0x367   : > { %p1336_p2 = pnand %p1911_p13, %p1910_p6 }
 0x369   : > { %1490 = dma.done.wait (!%p1336_p2), %s1216_s4, 16  }
 0x36a   : > { %1492 = vsyncadd (!%p1336_p2), %s1216_s4, 4294967280  ;;  %s19_s17 = sadd.s32 1, %s1515_s17   ;;  %s1912_s12 = smov %s1499_s13 }
 0x36b   : > { %p16_p5 = scmp.ge.s32.totalorder %s19_s17, 4   ;;  %s1913_s13 = smov %s1503_s14 }
 0x36c   : > { %s1914_s14 = smov %s1603_s26  ;;  %s1915_s15 = smov %s1511_s16 }
 0x36d   : > { %s1916_s16 = smov %s1918_s20  ;;  %18 = sbr.rel (!%p16_p5) target bundleno = 6 (0x6), region = 85 }
 0x374   :  { %1220 = vsyncpa [#allocation5], 1 }
 0x375   :  { %1222 = vsyncpa [#allocation5 + $0x1], 1 }
 0x376   :  { %1223 = vsyncpa [#allocation6], 1 }
 0x377   :  { %1225 = vsyncpa [#allocation6 + $0x1], 1 }

</bundles_post_ra>
